<compile_context>
chip_gen: v5e
topology: v5e:2x2
jax: 0.10.0
libtpu: 0.0.40
codegen_flags: <defaults>
</compile_context>

<pallas_src>
import functools

import jax
import jax.numpy as jnp
from jax.experimental import pallas as pl
from jax.experimental.pallas import tpu as pltpu

LANE = 128
SUBLANE = 8


def _round_up(x, m):
    return (x + m - 1) // m * m


def mapnet_kernel(x_ref, w1_ref, b1_ref, w2_ref, b2_ref, o_ref, *, b_valid):
    # x_ref : [Bp, INp]   resident across the grid (constant index_map)
    # w1_ref: [INp, Hp]   resident
    # b1_ref: [1, Hp]     resident
    # w2_ref: [Hp, TN]    column block of layer 2
    # b2_ref: [1, TN]     column block of layer-2 bias
    # o_ref : [Bp, TN]    column block of the output
    x = x_ref[...]

    # Layer 1 (MXU) + bias + ReLU.  Hidden is tiny (10 -> padded 128), so
    # recomputing it per output-column block is negligible at any scale.
    h = jnp.dot(x, w1_ref[...], preferred_element_type=jnp.float32) + b1_ref[...]
    h = jnp.maximum(h, 0.0)

    # Layer 2 (MXU) for this 128-wide column block.
    y = jnp.dot(h, w2_ref[...], preferred_element_type=jnp.float32) + b2_ref[...]

    # F.softmax(x, dim=0): normalize across the batch dimension (axis 0).
    # Columns are independent, so the per-block softmax is exact.  If the
    # batch was padded up to a sublane multiple, mask the padded rows out.
    if b_valid < y.shape[0]:
        row_ids = jax.lax.broadcasted_iota(jnp.int32, y.shape, 0)
        y = jnp.where(row_ids < b_valid, y, jnp.float32(-1e30))

    m = jnp.max(y, axis=0, keepdims=True)
    e = jnp.exp(y - m)
    s = jnp.sum(e, axis=0, keepdims=True)
    # Divide -> EUP reciprocal.  approx=False keeps the 1e-5 reference check.
    o_ref[...] = (e * pl.reciprocal(s, approx=False)).astype(o_ref.dtype)


def mapnet_forward(x, w1, b1, w2, b2, *, tn=LANE):
    B, in_size = x.shape
    hidden = w1.shape[1]
    out_size = w2.shape[1]

    bp = _round_up(B, SUBLANE)
    inp = _round_up(in_size, LANE)
    hp = _round_up(hidden, LANE)
    np_ = _round_up(out_size, tn)

    # Zero-pad everything to lane-dense shapes (exact; see header comment).
    xp = jnp.zeros((bp, inp), jnp.float32).at[:B, :in_size].set(x)
    w1p = jnp.zeros((inp, hp), jnp.float32).at[:in_size, :hidden].set(w1)
    b1p = jnp.zeros((1, hp), jnp.float32).at[:, :hidden].set(b1)
    w2p = jnp.zeros((hp, np_), jnp.float32).at[:hidden, :out_size].set(w2)
    b2p = jnp.zeros((1, np_), jnp.float32).at[:, :out_size].set(b2)

    kernel = functools.partial(mapnet_kernel, b_valid=B)

    out_p = pl.pallas_call(
        kernel,
        out_shape=jax.ShapeDtypeStruct((bp, np_), jnp.float32),
        grid_spec=pltpu.PrefetchScalarGridSpec(
            num_scalar_prefetch=0,
            grid=(np_ // tn,),
            in_specs=[
                pl.BlockSpec((bp, inp), lambda j: (0, 0)),   # x   (resident)
                pl.BlockSpec((inp, hp), lambda j: (0, 0)),   # W1  (resident)
                pl.BlockSpec((1, hp), lambda j: (0, 0)),     # b1  (resident)
                pl.BlockSpec((hp, tn), lambda j: (0, j)),    # W2 column block
                pl.BlockSpec((1, tn), lambda j: (0, j)),     # b2 column block
            ],
            out_specs=pl.BlockSpec((bp, tn), lambda j: (0, j)),
        ),
        compiler_params=pltpu.CompilerParams(
            dimension_semantics=("parallel",),  # column blocks independent -> megacore
        ),
    )(xp, w1p, b1p, w2p, b2p)

    return out_p[:B, :out_size]


def init_params(key, input_size, hidden, output_size):
    # Deterministic init mimicking nn.Linear's uniform(-1/sqrt(fan_in), 1/sqrt(fan_in)).
    k1, k2, k3, k4 = jax.random.split(key, 4)
    lim1 = 1.0 / jnp.sqrt(input_size)
    lim2 = 1.0 / jnp.sqrt(hidden)
    # stored pre-transposed: [in, out]
    w1 = jax.random.uniform(k1, (input_size, hidden), jnp.float32, -lim1, lim1)
    b1 = jax.random.uniform(k2, (1, hidden), jnp.float32, -lim1, lim1)
    w2 = jax.random.uniform(k3, (hidden, output_size), jnp.float32, -lim2, lim2)
    b2 = jax.random.uniform(k4, (1, output_size), jnp.float32, -lim2, lim2)
    return w1, b1, w2, b2


def mapnet_ref(x, w1, b1, w2, b2):
    h = jnp.maximum(x @ w1 + b1, 0.0)
    y = h @ w2 + b2
    return jax.nn.softmax(y, axis=0)


if __name__ == "__main__":
    B, INPUT_SIZE, HIDDEN, OUTPUT_SIZE = 8, 32, 10, 16

    key = jax.random.PRNGKey(0)
    kx, kp = jax.random.split(key)
    x = jax.random.normal(kx, (B, INPUT_SIZE), jnp.float32)
    w1, b1, w2, b2 = init_params(kp, INPUT_SIZE, HIDDEN, OUTPUT_SIZE)

    out = mapnet_forward(x, w1, b1, w2, b2)
    out = jax.block_until_ready(out)

    ref = mapnet_ref(x, w1, b1, w2, b2)
    assert out.shape == (B, OUTPUT_SIZE)
    assert jnp.allclose(out, ref, atol=1e-5, rtol=1e-5), "mismatch vs reference"
    # softmax over dim=0: each column sums to 1
    assert jnp.allclose(jnp.sum(out, axis=0), jnp.ones((OUTPUT_SIZE,)), atol=1e-5)

    print("KERNEL_OK")
</pallas_src>

<mosaic_0001>
module attributes {stable_mosaic.version = 11 : i64} {
  func.func @mapnet_kernel(%arg0: i32, %arg1: memref<8x128xf32, #tpu.memory_space<vmem>>, %arg2: memref<128x128xf32, #tpu.memory_space<vmem>>, %arg3: memref<1x128xf32, #tpu.memory_space<vmem>>, %arg4: memref<128x128xf32, #tpu.memory_space<vmem>>, %arg5: memref<1x128xf32, #tpu.memory_space<vmem>>, %arg6: memref<8x128xf32, #tpu.memory_space<vmem>>) attributes {dimension_semantics = [#tpu.dimension_semantics<parallel>], iteration_bounds = array<i64: 1>, scalar_prefetch = 0 : i64, scratch_operands = 0 : i64, tpu.core_type = #tpu.core_type<tc>, window_params = [{pipeline_mode = #tpu.pipeline_mode<synchronous>, transform_indices = @transform_0, window_bounds = array<i64: 8, 128>}, {pipeline_mode = #tpu.pipeline_mode<synchronous>, transform_indices = @transform_1, window_bounds = array<i64: 128, 128>}, {pipeline_mode = #tpu.pipeline_mode<synchronous>, transform_indices = @transform_2, window_bounds = array<i64: 1, 128>}, {transform_indices = @transform_3, window_bounds = array<i64: 128, 128>}, {transform_indices = @transform_4, window_bounds = array<i64: 1, 128>}, {transform_indices = @transform_5, window_bounds = array<i64: 8, 128>}]} {
    %c0 = arith.constant 0 : index
    %c0_0 = arith.constant 0 : index
    %0 = vector.load %arg1[%c0, %c0_0] : memref<8x128xf32, #tpu.memory_space<vmem>>, vector<8x128xf32>
    %c0_1 = arith.constant 0 : index
    %c0_2 = arith.constant 0 : index
    %1 = vector.load %arg2[%c0_1, %c0_2] : memref<128x128xf32, #tpu.memory_space<vmem>>, vector<128x128xf32>
    %cst = arith.constant dense<0.000000e+00> : vector<8x128xf32>
    %2 = tpu.matmul %0, %1, %cst {dimension_numbers = #tpu.dot_dimension_numbers<[1], [0], [0], [1], [0, 0, 1, 1], [], []>} : vector<8x128xf32>, vector<128x128xf32>, vector<8x128xf32> -> vector<8x128xf32>
    %c0_3 = arith.constant 0 : index
    %c0_4 = arith.constant 0 : index
    %3 = vector.load %arg3[%c0_3, %c0_4] : memref<1x128xf32, #tpu.memory_space<vmem>>, vector<1x128xf32>
    %4 = vector.broadcast %3 : vector<1x128xf32> to vector<8x128xf32>
    %5 = arith.addf %2, %4 : vector<8x128xf32>
    %cst_5 = arith.constant 0.000000e+00 : f32
    %6 = vector.broadcast %cst_5 : f32 to vector<8x128xf32>
    %7 = arith.maximumf %5, %6 : vector<8x128xf32>
    %c0_6 = arith.constant 0 : index
    %c0_7 = arith.constant 0 : index
    %8 = vector.load %arg4[%c0_6, %c0_7] : memref<128x128xf32, #tpu.memory_space<vmem>>, vector<128x128xf32>
    %cst_8 = arith.constant dense<0.000000e+00> : vector<8x128xf32>
    %9 = tpu.matmul %7, %8, %cst_8 {dimension_numbers = #tpu.dot_dimension_numbers<[1], [0], [0], [1], [0, 0, 1, 1], [], []>} : vector<8x128xf32>, vector<128x128xf32>, vector<8x128xf32> -> vector<8x128xf32>
    %c0_9 = arith.constant 0 : index
    %c0_10 = arith.constant 0 : index
    %10 = vector.load %arg5[%c0_9, %c0_10] : memref<1x128xf32, #tpu.memory_space<vmem>>, vector<1x128xf32>
    %11 = vector.broadcast %10 : vector<1x128xf32> to vector<8x128xf32>
    %12 = arith.addf %9, %11 : vector<8x128xf32>
    %cst_11 = arith.constant dense<0xFF800000> : vector<128xf32>
    %13 = vector.multi_reduction <maximumf>, %12, %cst_11 [0] : vector<8x128xf32> to vector<128xf32>
    %14 = vector.shape_cast %13 : vector<128xf32> to vector<1x128xf32>
    %15 = vector.broadcast %14 : vector<1x128xf32> to vector<8x128xf32>
    %16 = arith.subf %12, %15 : vector<8x128xf32>
    %17 = math.exp %16 : vector<8x128xf32>
    %cst_12 = arith.constant dense<0.000000e+00> : vector<128xf32>
    %18 = vector.multi_reduction <add>, %17, %cst_12 [0] : vector<8x128xf32> to vector<128xf32>
    %19 = vector.shape_cast %18 : vector<128xf32> to vector<1x128xf32>
    %20 = tpu.reciprocal %19 : vector<1x128xf32> -> vector<1x128xf32>
    %21 = vector.broadcast %20 : vector<1x128xf32> to vector<8x128xf32>
    %22 = arith.mulf %17, %21 : vector<8x128xf32>
    %c0_13 = arith.constant 0 : index
    %c0_14 = arith.constant 0 : index
    %23 = vector.load %arg6[%c0_13, %c0_14] : memref<8x128xf32, #tpu.memory_space<vmem>>, vector<8x128xf32>
    tpu.vector_store %arg6[%c0_13, %c0_14], %22 {strides = array<i32>} : memref<8x128xf32, #tpu.memory_space<vmem>>, vector<8x128xf32>,
    return
  }
  func.func @transform_0(%arg0: i32) -> (i32, i32) {
    %c0_i32 = arith.constant 0 : i32
    %c0_i32_0 = arith.constant 0 : i32
    %c0_i32_1 = arith.constant 0 : i32
    return %c0_i32, %c0_i32_0 : i32, i32
  }
  func.func @transform_1(%arg0: i32) -> (i32, i32) {
    %c0_i32 = arith.constant 0 : i32
    %c0_i32_0 = arith.constant 0 : i32
    %c0_i32_1 = arith.constant 0 : i32
    return %c0_i32, %c0_i32_0 : i32, i32
  }
  func.func @transform_2(%arg0: i32) -> (i32, i32) {
    %c0_i32 = arith.constant 0 : i32
    %c0_i32_0 = arith.constant 0 : i32
    %c0_i32_1 = arith.constant 0 : i32
    return %c0_i32, %c0_i32_0 : i32, i32
  }
  func.func @transform_3(%arg0: i32) -> (i32, i32) {
    %c0_i32 = arith.constant 0 : i32
    %c0_i32_0 = arith.constant 0 : i32
    return %c0_i32, %arg0 : i32, i32
  }
  func.func @transform_4(%arg0: i32) -> (i32, i32) {
    %c0_i32 = arith.constant 0 : i32
    %c0_i32_0 = arith.constant 0 : i32
    return %c0_i32, %arg0 : i32, i32
  }
  func.func @transform_5(%arg0: i32) -> (i32, i32) {
    %c0_i32 = arith.constant 0 : i32
    %c0_i32_0 = arith.constant 0 : i32
    return %c0_i32, %arg0 : i32, i32
  }
}

</mosaic_0001>

<bundles_post_ra>
// kernel: tpu_custom_call.1
= control target key start
LH: loop header
LB: loop body
LE: loop exit
PB: predicated region body
PF: predicated region fallthrough
CT: control target
= control target key end

     0   :  { %10 = vsyncpa [#allocation3], 0  ;;  %s365_s0 = inlined_call_operand.hbm [shape: f32[8,128], index: 0, kind: input, shape index: {}]   ;;  %s366_s1 = inlined_call_operand.hbm [shape: f32[128,128], index: 1, kind: input, shape index: {}]   ;;  %s367_s2 = inlined_call_operand.vmem [shape: f32[1,128], index: 2, kind: input, shape index: {}]   ;;  %s368_s3 = inlined_call_operand.hbm [shape: f32[128,128], index: 3, kind: input, shape index: {}]   ;;  %s369_s4 = inlined_call_operand.vmem [shape: f32[1,128], index: 4, kind: input, shape index: {}]   ;;  %s370_s5 = inlined_call_operand.hbm [shape: f32[8,128], index: 5, kind: output, shape index: {}]  }
   0x1   :  { %11 = vsyncpa [#allocation6], 0  ;;  %s28_s20 = sshll.u32 %s366_s1, 4  ;;  %s29_s20 = int_to_ptr.hbm [resolvable:$true] %s28_s20 }
   0x2   :  { %12 = vsyncpa [#allocation4], 0  ;;  %s311_s21 = smov [#allocation5]   ;;  %s18_s25 = sshll.u32 %s365_s0, 4  ;;  %s19_s25 = int_to_ptr.hbm [resolvable:$true] %s18_s25 }
   0x3   :  { %s30_s22 = sshll.u32 %s311_s21, 4  ;;  %s312_s26 = smov 128   ;;  %s31_s22 = int_to_ptr.vmem [resolvable:$true] %s30_s22 }
   0x4   :  { %s313_s27 = smov 8   ;;  %s314_s28 = smov [#allocation2]  }
   0x5   :  { %36 = dma.hbm_to_vmem [thread:$0]  %s29_s20, 2048, %s31_s22, [#allocation6], %s312_s26, %s312_s26, %s313_s27  }
   0x6   :  { %s20_s29 = sshll.u32 %s314_s28, 4  ;;  %s43_s7 = sshll.u32 %s368_s3, 4  ;;  %s21_s29 = int_to_ptr.vmem [resolvable:$true] %s20_s29  ;;  %s44_s7 = int_to_ptr.hbm [resolvable:$true] %s43_s7 }
   0x7   :  { %23 = dma.hbm_to_vmem [thread:$0]  %s19_s25, 128, %s21_s29, [#allocation3]  }
   0x8   :  { %s315_s1 = smov [#allocation7]  }
   0x9   :  { %s45_s8 = sshll.u32 %s315_s1, 4  ;;  %s46_s8 = int_to_ptr.vmem [resolvable:$true] %s45_s8 }
   0xa   :  { %51 = dma.hbm_to_vmem [thread:$0]  %s44_s7, 2048, %s46_s8, [#allocation6], %s312_s26, %s312_s26, %s313_s27  }
   0xb   :  { %305 = dma.done.wait [#allocation3], 128  }
   0xc   :  { %306 = vsyncadd [#allocation3], 4294967168 }
   0xd   :  { %307 = dma.done.wait [#allocation6], 4096  }
   0xe   :  { %308 = vsyncadd [#allocation6], 4294963200  ;;  %v82_v0 = vld [vmem:[#allocation5 + $0x78] sm:$0xff]  ;;  %v81_v1 = vld [vmem:[#allocation5 + $0x70] sm:$0xff]  ;;  %s186_s13 = sshll.u32 %s370_s5, 4  ;;  %s187_s13 = int_to_ptr.hbm [resolvable:$true] %s186_s13 }
   0xf   :  { %87 = vmatpush.msra.mxu0 %v82_v0  ;;  %v80_v2 = vld [vmem:[#allocation5 + $0x68] sm:$0xff]  ;;  %v79_v3 = vld [vmem:[#allocation5 + $0x60] sm:$0xff]  ;;  %v123_v4 = vld [vmem:[#allocation7 + $0x78] sm:$0xff] }
  0x10   :  { %v78_v5 = vld [vmem:[#allocation5 + $0x58] sm:$0xff]  ;;  %128 = vmatpush.msra.mxu1 %v123_v4  ;;  %v122_v6 = vld [vmem:[#allocation7 + $0x70] sm:$0xff]  ;;  %v121_v7 = vld [vmem:[#allocation7 + $0x68] sm:$0xff] }
  0x11   :  { %88 = vmatpush.msra.mxu0 %v81_v1  ;;  %v77_v8 = vld [vmem:[#allocation5 + $0x50] sm:$0xff]  ;;  %v120_v9 = vld [vmem:[#allocation7 + $0x60] sm:$0xff]  ;;  %v76_v10 = vld [vmem:[#allocation5 + $0x48] sm:$0xff] }
  0x12   :  { %129 = vmatpush.msra.mxu1 %v122_v6  ;;  %v119_v11 = vld [vmem:[#allocation7 + $0x58] sm:$0xff]  ;;  %v75_v12 = vld [vmem:[#allocation5 + $0x40] sm:$0xff]  ;;  %v118_v13 = vld [vmem:[#allocation7 + $0x50] sm:$0xff] }
  0x13   :  { %89 = vmatpush.msra.mxu0 %v80_v2  ;;  %v74_v14 = vld [vmem:[#allocation5 + $0x38] sm:$0xff]  ;;  %v117_v15 = vld [vmem:[#allocation7 + $0x48] sm:$0xff]  ;;  %v73_v16 = vld [vmem:[#allocation5 + $0x30] sm:$0xff] }
  0x14   :  { %130 = vmatpush.msra.mxu1 %v121_v7  ;;  %v116_v17 = vld [vmem:[#allocation7 + $0x40] sm:$0xff]  ;;  %v72_v18 = vld [vmem:[#allocation5 + $0x28] sm:$0xff]  ;;  %v115_v19 = vld [vmem:[#allocation7 + $0x38] sm:$0xff] }
  0x15   :  { %90 = vmatpush.msra.mxu0 %v79_v3  ;;  %v71_v20 = vld [vmem:[#allocation5 + $0x20] sm:$0xff]  ;;  %v114_v21 = vld [vmem:[#allocation7 + $0x30] sm:$0xff]  ;;  %v70_v22 = vld [vmem:[#allocation5 + $0x18] sm:$0xff] }
  0x16   :  { %131 = vmatpush.msra.mxu1 %v120_v9  ;;  %v113_v23 = vld [vmem:[#allocation7 + $0x28] sm:$0xff]  ;;  %v69_v24 = vld [vmem:[#allocation5 + $0x10] sm:$0xff]  ;;  %v112_v25 = vld [vmem:[#allocation7 + $0x20] sm:$0xff] }
  0x17   :  { %91 = vmatpush.msra.mxu0 %v78_v5  ;;  %v68_v26 = vld [vmem:[#allocation5 + $0x8] sm:$0xff]  ;;  %v111_v27 = vld [vmem:[#allocation7 + $0x18] sm:$0xff]  ;;  %v67_v28 = vld [vmem:[#allocation5] sm:$0xff] }
  0x18   :  { %132 = vmatpush.msra.mxu1 %v119_v11  ;;  %v66_v29 = vld [vmem:[#allocation2] sm:$0xff]  ;;  %v110_v30 = vld [vmem:[#allocation7 + $0x10] sm:$0xff]  ;;  %v109_v31 = vld [vmem:[#allocation7 + $0x8] sm:$0xff] }
  0x19   :  { %92 = vmatpush.msra.mxu0 %v77_v8  ;;  %v108_v32 = vld [vmem:[#allocation7] sm:$0xff]  ;;  %v203_v33 = vld [vmem:[%s367_s2] ss:$0 sm:$0xff]  ;;  %s316_s2 = smov [#allocation8]  }
  0x1a   :  { %133 = vmatpush.msra.mxu1 %v118_v13  ;;  %v204_v37 = vld [vmem:[%s369_s4] ss:$0 sm:$0xff]  ;;  %s184_s4 = sshll.u32 %s316_s2, 4  ;;  %s185_s4 = int_to_ptr.vmem [resolvable:$true] %s184_s4 }
  0x1b   :  { %93 = vmatpush.msra.mxu0 %v76_v10 }
  0x1c   :  { %134 = vmatpush.msra.mxu1 %v117_v15 }
  0x1d   :  { %94 = vmatpush.msra.mxu0 %v75_v12 }
  0x1e   :  { %135 = vmatpush.msra.mxu1 %v116_v17 }
  0x1f   :  { %95 = vmatpush.msra.mxu0 %v74_v14 }
  0x20   :  { %136 = vmatpush.msra.mxu1 %v115_v19 }
  0x21   :  { %96 = vmatpush.msra.mxu0 %v73_v16 }
  0x22   :  { %137 = vmatpush.msra.mxu1 %v114_v21 }
  0x23   :  { %97 = vmatpush.msra.mxu0 %v72_v18 }
  0x24   :  { %138 = vmatpush.msra.mxu1 %v113_v23 }
  0x25   :  { %98 = vmatpush.msra.mxu0 %v71_v20 }
  0x26   :  { %139 = vmatpush.msra.mxu1 %v112_v25 }
  0x27   :  { %99 = vmatpush.msra.mxu0 %v70_v22 }
  0x28   :  { %140 = vmatpush.msra.mxu1 %v111_v27 }
  0x29   :  { %100 = vmatpush.msra.mxu0 %v69_v24 }
  0x2a   :  { %141 = vmatpush.msra.mxu1 %v110_v30 }
  0x2b   :  { %101 = vmatpush.msra.mxu0 %v68_v26 }
  0x2c   :  { %142 = vmatpush.msra.mxu1 %v109_v31 }
  0x2d   :  { %102 = vmatpush.msra.mxu0 %v67_v28 }
  0x2e   :  { %103 = vmatmul.f32.vlgmr.msra.gmra.mxu0 %v66_v29  ;;  %143 = vmatpush.msra.mxu1 %v108_v32 }
  0xab   :  { %v104_v34 = vpop.f32.mrf.mxu0 }
  0xac   :  { %v105_v35 = vadd.f32 %v203_v33, %v104_v34 }
  0xae   :  { %v107_v36 = vmax.f32 %v105_v35, 0.0 }
  0xb0   :  { %144 = vmatmul.f32.vlgmr.msra.gmra.mxu1 %v107_v36 }
 0x12d   :  { %v145_v38 = vpop.f32.mrf.mxu1 }
 0x12e   :  { %v146_v39 = vadd.f32 %v204_v37, %v145_v38 }
 0x130   :  { %v148_v40 = vrot.slane %v146_v39, 4 }
 0x132   :  { %v149_v41 = vmax.f32 %v146_v39, %v148_v40 }
 0x134   :  { %v150_v42 = vrot.slane %v149_v41, 2 }
 0x136   :  { %v151_v43 = vmax.f32 %v149_v41, %v150_v42 }
 0x138   :  { %v152_v44 = vrot.slane %v151_v43, 1 }
 0x13a   :  { %v153_v45 = vmax.f32 %v151_v43, %v152_v44 }
 0x13c   :  { %v154_v46 = vsub.f32 %v146_v39, %v153_v45 }
 0x13e   :  { %v155_v47 = vmul.f32 1.442695, %v154_v46 }
 0x140   :  { %205 = vpow2.f32 %v155_v47 }
 0x146   :  { %v206_v48 = vpop.eup %205 }
 0x147   :  { %v157_v49 = vrot.slane %v206_v48, 4 }
 0x149   :  { %v158_v50 = vadd.f32 %v206_v48, %v157_v49 }
 0x14b   :  { %v159_v51 = vrot.slane %v158_v50, 2 }
 0x14d   :  { %v160_v52 = vadd.f32 %v159_v51, %v158_v50 }
 0x14f   :  { %v161_v53 = vrot.slane %v160_v52, 1 }
 0x151   :  { %v162_v54 = vadd.f32 %v161_v53, %v160_v52 }
 0x153   :  { %207 = vrcp.f32 %v162_v54  ;;  %v174_v58 = vand.u32 2147483648, %v162_v54  ;;  %v172_v60 = vand.u32 2147483647, %v162_v54  ;;  %vm168_vm1 = vweird.f32 %v162_v54 }
 0x155   :  { %v175_v62 = vor.u32 1.1754944e-38, %v174_v58  ;;  %vm173_vm3 = vcmp.eq.f32.partialorder %v172_v60, 8.507059e+37 }
 0x159   :  { %v208_v55 = vpop.eup %207 }
 0x15a   :  { %v164_v56 = vmul.f32 %v208_v55, %v162_v54  ;;  %vm169_vm0 = vweird.f32 %v208_v55 }
 0x15b   :  { %vm170_vm2 = vmor %vm168_vm1, %vm169_vm0 }
 0x15c   :  { %v165_v57 = vsub.f32 1.0, %v164_v56 }
 0x15e   :  { %v166_v59 = vmul.f32 %v208_v55, %v165_v57 }
 0x160   :  { %v167_v61 = vadd.f32 %v208_v55, %v166_v59 }
 0x162   :  { %v171_v63 = vsel %vm170_vm2, %v208_v55, %v167_v61 }
 0x163   :  { %v176_v0 = vsel %vm173_vm3, %v175_v62, %v171_v63 }
 0x164   :  { %v177_v1 = vmul.f32 %v206_v48, %v176_v0 }
 0x166   :  { %178 = vst [vmem:[#allocation8] sm:$0xff] %v177_v1 }
 0x167   :  { %189 = dma.vmem_to_hbm [thread:$0]  %s185_s4, 128, %s187_s13, [#allocation4]  }
 0x168   :  { %309 = dma.done.wait [#allocation4], 128  }
 0x169   :  { %310 = vsyncadd [#allocation4], 4294967168 }
 0x16a   :  { %194 = vsyncpa [#allocation3], 1 }
 0x16b   :  { %195 = vsyncpa [#allocation6], 1 }
 0x16c   :  { %196 = vsyncpa [#allocation4], 1 }

</bundles_post_ra>
